<compile_context>
chip_gen: v7x
topology: tpu7x:2x2x1
jax: 0.10.0
libtpu: 0.0.40
codegen_flags: <defaults>
</compile_context>

<pallas_src>
import functools

import jax
import jax.numpy as jnp
from jax import lax
from jax.experimental import pallas as pl
from jax.experimental.pallas import tpu as pltpu


# ----------------------------------------------------------------------------
# Fused kernel: both GAT layers, all heads, all batches, one step (no grid).
#   xblk_ref  : (nH*B*N, nH*Fin)  head-block-diagonal replicated x
#   wbd_ref   : (nH*Fin, nH*H)    head-block-diagonal hidden W's
#   a1c_ref   : (1, nH*H)         hidden a1's concatenated over heads
#   a2c_ref   : (1, nH*H)         hidden a2's concatenated over heads
#   maskh_ref : (nH*B*N, nH*B*N)  block-diag adjacency mask (hidden layer)
#   sel_ref   : (B*N, nH*B*N)     head-row-block collapse selector
#   wo_ref    : (nH*H, out)       output-head W
#   a1o_ref   : (1, out)          output-head a1 (row)
#   a2o_ref   : (1, out)          output-head a2 (row)
#   masko_ref : (B*N, B*N)        block-diag adjacency mask (output layer)
#   out_ref   : (B*N, out)
# ----------------------------------------------------------------------------
def _fused_gat_kernel(xblk_ref, wbd_ref, a1c_ref, a2c_ref, maskh_ref, sel_ref,
                      wo_ref, a1o_ref, a2o_ref, masko_ref, out_ref, *, alpha):
    f32 = jnp.float32

    def leaky_relu(e):
        return jnp.where(e > 0, e, alpha * e)

    def elu(v):
        # Clamp before exp so the unselected branch never produces inf.
        return jnp.where(v > 0, v, jnp.exp(jnp.minimum(v, 0.0)) - 1.0)

    def attention(f1_col, f2t_row, mask):
        # e[i, j] = LeakyReLU(f1[i] + f2[j]); adj/block mask (torch: -9e15);
        # softmax over i (== torch dim=1).  One wide pass for every block.
        e = leaky_relu(f1_col + f2t_row)
        e = jnp.where(mask > 0, e, -9e15)
        m = jnp.max(e, axis=0, keepdims=True)
        p = jnp.exp(e - m)
        denom = jnp.sum(p, axis=0, keepdims=True)
        return p * pl.reciprocal(denom, approx=False)

    def rowdot(h, vec_row):
        # per-row <h[r, :], vec> as a column (VPU mul + lane reduce).
        return jnp.sum(h * vec_row, axis=1, keepdims=True)

    def rowdot_t(h, vec_row):
        # same quantity laid out as a row (trans-B contraction, no transpose).
        return lax.dot_general(vec_row, h,
                               dimension_numbers=(((1,), (1,)), ((), ())),
                               preferred_element_type=f32)

    # ------------- Hidden layer: all heads x batches in one shot ------------
    # h_wide[(hd,b,n), (hd',h)] = (x[b,n] @ W_hd)[h] if hd'==hd else 0
    h_wide = jnp.dot(xblk_ref[...], wbd_ref[...], preferred_element_type=f32)

    f1 = rowdot(h_wide, a1c_ref[...])              # (nH*B*N, 1)
    f2t = rowdot_t(h_wide, a2c_ref[...])           # (1, nH*B*N)
    att = attention(f1, f2t, maskh_ref[...])       # (nH*B*N, nH*B*N) block-diag

    # (sel @ att) collapses the head row-blocks; multiplying by h_wide both
    # aggregates neighbors and lands every head in its own lane block of the
    # concat:  hp_cat[(b,n), (hd,h)] = sum_j att[hd,b][n,j] * h[hd,b,j,h]
    hp_cat = jnp.dot(jnp.dot(sel_ref[...], att, preferred_element_type=f32),
                     h_wide, preferred_element_type=f32)       # (B*N, nH*H)
    hp_cat = elu(hp_cat)

    # ------------------- Output head: all batches at once -------------------
    h_o = jnp.dot(hp_cat, wo_ref[...], preferred_element_type=f32)   # (B*N, out)
    f1_o = rowdot(h_o, a1o_ref[...])               # (B*N, 1)
    f2t_o = rowdot_t(h_o, a2o_ref[...])            # (1, B*N)
    att_o = attention(f1_o, f2t_o, masko_ref[...])                    # (B*N, B*N)
    out = elu(jnp.dot(att_o, h_o, preferred_element_type=f32))        # (B*N, out)
    out_ref[...] = out.astype(out_ref.dtype)       # single lane-aligned store


# ----------------------------------------------------------------------------
# Wrapper: wrapper-side layout plumbing (block-diagonal folds, masks) and one
# gridless pallas_call (everything fits VMEM trivially at these shapes).
# ----------------------------------------------------------------------------
def intra_domain_forward(x, params, adj, *, alpha):
    B, N, Fin = x.shape
    W_h, a1_h, a2_h = params["W_h"], params["a1_h"], params["a2_h"]
    W_o, a1_o, a2_o = params["W_o"], params["a1_o"], params["a2_o"]
    nH, _, H = W_h.shape
    out_dim = W_o.shape[1]
    BN = B * N
    f32 = jnp.float32

    x2d = x.reshape(BN, Fin).astype(f32)
    adj = adj.astype(f32)
    eye_h = jnp.eye(nH, dtype=f32)

    # Head-block-diagonal input / weights so ONE MXU matmul produces h for
    # every (head, batch, node) with the head axis on sublanes:
    #   X_blk[(hd,b,n), (hd',f)] = x[b,n,f]     if hd'==hd else 0
    #   W_bd [(hd',f), (hd,h)]   = W_h[hd',f,h] if hd==hd'  else 0
    X_blk = (eye_h[:, None, :, None] * x2d[None, :, None, :]
             ).reshape(nH * BN, nH * Fin)
    W_bd = (W_h[:, :, None, :] * eye_h[:, None, :, None]
            ).reshape(nH * Fin, nH * H)

    # Attention vectors concatenated over heads (match h_wide's lane blocks).
    a1_cat = a1_h[:, :, 0].reshape(1, nH * H)
    a2_cat = a2_h[:, :, 0].reshape(1, nH * H)

    # Block-diagonal adjacency masks: adj inside each (head,batch) block for
    # the hidden layer, each batch block for the output layer.
    mask_h = jnp.kron(jnp.eye(nH * B, dtype=f32), adj)    # (nH*B*N, nH*B*N)
    mask_o = jnp.kron(jnp.eye(B, dtype=f32), adj)         # (B*N, B*N)

    # Head-row-block collapse: sel[(b,n), (hd,b',n')] = [b'==b and n'==n]
    sel = jnp.tile(jnp.eye(BN, dtype=f32), (1, nH))       # (B*N, nH*B*N)

    kernel = functools.partial(_fused_gat_kernel, alpha=alpha)
    vmem = pltpu.MemorySpace.VMEM
    out2d = pl.pallas_call(
        kernel,
        out_shape=jax.ShapeDtypeStruct((BN, out_dim), f32),
        in_specs=[pl.BlockSpec(memory_space=vmem)] * 10,
        out_specs=pl.BlockSpec(memory_space=vmem),
    )(X_blk, W_bd, a1_cat, a2_cat, mask_h, sel,
      W_o.astype(f32), a1_o.T.astype(f32), a2_o.T.astype(f32), mask_o)
    return out2d.reshape(B, N, out_dim)


# ----------------------------------------------------------------------------
# Pure-JAX reference (faithful to the PyTorch module, incl. the adj mask).
# ----------------------------------------------------------------------------
def _ref_head(x, W, a1, a2, adj, alpha, apply_elu):
    h = jnp.einsum("bnf,fo->bno", x, W)
    f1 = jnp.einsum("bno,ok->bnk", h, a1)            # (B, N, 1)
    f2 = jnp.einsum("bno,ok->bnk", h, a2)            # (B, N, 1)
    e = f1 + jnp.swapaxes(f2, 1, 2)                  # e[b,i,j] = f1[b,i] + f2[b,j]
    e = jnp.where(e > 0, e, alpha * e)
    e = jnp.where(adj[None] > 0, e, -9e15)
    att = jax.nn.softmax(e, axis=1)
    hp = jnp.einsum("bij,bjo->bio", att, h)
    if apply_elu:
        hp = jnp.where(hp > 0, hp, jnp.exp(jnp.minimum(hp, 0.0)) - 1.0)
    return hp


def intra_domain_reference(x, params, adj, *, alpha):
    heads = [
        _ref_head(x, params["W_h"][h], params["a1_h"][h], params["a2_h"][h],
                  adj, alpha, True)
        for h in range(params["W_h"].shape[0])
    ]
    x_cat = jnp.concatenate(heads, axis=-1)
    return _ref_head(x_cat, params["W_o"], params["a1_o"], params["a2_o"],
                     adj, alpha, True)


# ----------------------------------------------------------------------------
# Deterministic parameter init (xavier_normal_, gain=sqrt(2)), torch shapes.
# ----------------------------------------------------------------------------
def _xavier_normal(key, shape, gain=2.0 ** 0.5):
    std = gain * (2.0 / (shape[0] + shape[1])) ** 0.5
    return std * jax.random.normal(key, shape, dtype=jnp.float32)


def init_params(key, feature_dim, hidden_dim, out_dim, n_heads):
    ks = jax.random.split(key, 3 * n_heads + 3)
    W_h = jnp.stack([_xavier_normal(ks[3 * h + 0], (feature_dim, hidden_dim))
                     for h in range(n_heads)])                           # (nH, Fin, H)
    a1_h = jnp.stack([_xavier_normal(ks[3 * h + 1], (hidden_dim, 1))
                      for h in range(n_heads)])                          # (nH, H, 1)
    a2_h = jnp.stack([_xavier_normal(ks[3 * h + 2], (hidden_dim, 1))
                      for h in range(n_heads)])                          # (nH, H, 1)
    W_o = _xavier_normal(ks[-3], (n_heads * hidden_dim, out_dim))
    a1_o = _xavier_normal(ks[-2], (out_dim, 1))
    a2_o = _xavier_normal(ks[-1], (out_dim, 1))
    return dict(W_h=W_h, a1_h=a1_h, a2_h=a2_h, W_o=W_o, a1_o=a1_o, a2_o=a2_o)


if __name__ == "__main__":
    # Small, IntraDomain-consistent shapes.
    B, N = 2, 8                 # batch, n_nodes
    feature_dim = 32
    hidden_dim = 32
    out_dim = 16
    n_heads = 3
    alpha = 0.2

    key = jax.random.PRNGKey(0)
    k_x, k_p = jax.random.split(key)
    x = jax.random.normal(k_x, (B, N, feature_dim), dtype=jnp.float32)
    params = init_params(k_p, feature_dim, hidden_dim, out_dim, n_heads)
    adj = jnp.ones((N, N), dtype=jnp.float32)   # IntraDomain.get_adj (all-ones)

    fwd = jax.jit(functools.partial(intra_domain_forward, alpha=alpha))
    out = fwd(x, params, adj)
    jax.block_until_ready(out)

    ref = intra_domain_reference(x, params, adj, alpha=alpha)
    assert out.shape == (B, N, out_dim)
    assert jnp.allclose(out, ref, rtol=1e-4, atol=1e-4), "mismatch vs JAX reference"

    print("KERNEL_OK")
</pallas_src>

<mosaic_0001>
module attributes {stable_mosaic.version = 11 : i64} {
  func.func @_fused_gat_kernel(%arg0: memref<48x96xf32, #tpu.memory_space<vmem>>, %arg1: memref<96x96xf32, #tpu.memory_space<vmem>>, %arg2: memref<1x96xf32, #tpu.memory_space<vmem>>, %arg3: memref<1x96xf32, #tpu.memory_space<vmem>>, %arg4: memref<48x48xf32, #tpu.memory_space<vmem>>, %arg5: memref<16x48xf32, #tpu.memory_space<vmem>>, %arg6: memref<96x16xf32, #tpu.memory_space<vmem>>, %arg7: memref<1x16xf32, #tpu.memory_space<vmem>>, %arg8: memref<1x16xf32, #tpu.memory_space<vmem>>, %arg9: memref<16x16xf32, #tpu.memory_space<vmem>>, %arg10: memref<16x16xf32, #tpu.memory_space<vmem>>) attributes {dimension_semantics = [], scalar_prefetch = 0 : i64, scratch_operands = 0 : i64, tpu.core_type = #tpu.core_type<tc>} {
    %c0 = arith.constant 0 : index
    %c0_0 = arith.constant 0 : index
    %0 = vector.load %arg0[%c0, %c0_0] : memref<48x96xf32, #tpu.memory_space<vmem>>, vector<48x96xf32>
    %c0_1 = arith.constant 0 : index
    %c0_2 = arith.constant 0 : index
    %1 = vector.load %arg1[%c0_1, %c0_2] : memref<96x96xf32, #tpu.memory_space<vmem>>, vector<96x96xf32>
    %cst = arith.constant dense<0.000000e+00> : vector<48x96xf32>
    %2 = tpu.matmul %0, %1, %cst {dimension_numbers = #tpu.dot_dimension_numbers<[1], [0], [0], [1], [0, 0, 1, 1], [], []>} : vector<48x96xf32>, vector<96x96xf32>, vector<48x96xf32> -> vector<48x96xf32>
    %c0_3 = arith.constant 0 : index
    %c0_4 = arith.constant 0 : index
    %3 = vector.load %arg2[%c0_3, %c0_4] : memref<1x96xf32, #tpu.memory_space<vmem>>, vector<1x96xf32>
    %4 = vector.broadcast %3 : vector<1x96xf32> to vector<48x96xf32>
    %5 = arith.mulf %2, %4 : vector<48x96xf32>
    %cst_5 = arith.constant dense<0.000000e+00> : vector<48xf32>
    %6 = vector.multi_reduction <add>, %5, %cst_5 [1] : vector<48x96xf32> to vector<48xf32>
    %7 = vector.shape_cast %6 : vector<48xf32> to vector<48x1xf32>
    %c0_6 = arith.constant 0 : index
    %c0_7 = arith.constant 0 : index
    %8 = vector.load %arg3[%c0_6, %c0_7] : memref<1x96xf32, #tpu.memory_space<vmem>>, vector<1x96xf32>
    %cst_8 = arith.constant dense<0.000000e+00> : vector<1x48xf32>
    %9 = tpu.matmul %8, %2, %cst_8 {dimension_numbers = #tpu.dot_dimension_numbers<[1], [1], [0], [0], [0, 0, 1, 0], [], []>} : vector<1x96xf32>, vector<48x96xf32>, vector<1x48xf32> -> vector<1x48xf32>
    %c0_9 = arith.constant 0 : index
    %c0_10 = arith.constant 0 : index
    %10 = vector.load %arg4[%c0_9, %c0_10] : memref<48x48xf32, #tpu.memory_space<vmem>>, vector<48x48xf32>
    %11 = vector.broadcast %7 : vector<48x1xf32> to vector<48x48xf32>
    %12 = vector.broadcast %9 : vector<1x48xf32> to vector<48x48xf32>
    %13 = arith.addf %11, %12 : vector<48x48xf32>
    %cst_11 = arith.constant 0.000000e+00 : f32
    %14 = vector.broadcast %cst_11 : f32 to vector<48x48xf32>
    %15 = arith.cmpf ogt, %13, %14 : vector<48x48xf32>
    %cst_12 = arith.constant 2.000000e-01 : f32
    %16 = vector.broadcast %cst_12 : f32 to vector<48x48xf32>
    %17 = arith.mulf %16, %13 : vector<48x48xf32>
    %18 = arith.select %15, %13, %17 : vector<48x48xi1>, vector<48x48xf32>
    %cst_13 = arith.constant 0.000000e+00 : f32
    %19 = vector.broadcast %cst_13 : f32 to vector<48x48xf32>
    %20 = arith.cmpf ogt, %10, %19 : vector<48x48xf32>
    %cst_14 = arith.constant -9.000000e+15 : f32
    %21 = vector.broadcast %cst_14 : f32 to vector<48x48xf32>
    %22 = arith.select %20, %18, %21 : vector<48x48xi1>, vector<48x48xf32>
    %cst_15 = arith.constant dense<0xFF800000> : vector<48xf32>
    %23 = vector.multi_reduction <maximumf>, %22, %cst_15 [0] : vector<48x48xf32> to vector<48xf32>
    %24 = vector.shape_cast %23 : vector<48xf32> to vector<1x48xf32>
    %25 = vector.broadcast %24 : vector<1x48xf32> to vector<48x48xf32>
    %26 = arith.subf %22, %25 : vector<48x48xf32>
    %27 = math.exp %26 : vector<48x48xf32>
    %cst_16 = arith.constant dense<0.000000e+00> : vector<48xf32>
    %28 = vector.multi_reduction <add>, %27, %cst_16 [0] : vector<48x48xf32> to vector<48xf32>
    %29 = vector.shape_cast %28 : vector<48xf32> to vector<1x48xf32>
    %30 = tpu.reciprocal %29 : vector<1x48xf32> -> vector<1x48xf32>
    %31 = vector.broadcast %30 : vector<1x48xf32> to vector<48x48xf32>
    %32 = arith.mulf %27, %31 : vector<48x48xf32>
    %c0_17 = arith.constant 0 : index
    %c0_18 = arith.constant 0 : index
    %33 = vector.load %arg5[%c0_17, %c0_18] : memref<16x48xf32, #tpu.memory_space<vmem>>, vector<16x48xf32>
    %cst_19 = arith.constant dense<0.000000e+00> : vector<16x48xf32>
    %34 = tpu.matmul %33, %32, %cst_19 {dimension_numbers = #tpu.dot_dimension_numbers<[1], [0], [0], [1], [0, 0, 1, 1], [], []>} : vector<16x48xf32>, vector<48x48xf32>, vector<16x48xf32> -> vector<16x48xf32>
    %cst_20 = arith.constant dense<0.000000e+00> : vector<16x96xf32>
    %35 = tpu.matmul %34, %2, %cst_20 {dimension_numbers = #tpu.dot_dimension_numbers<[1], [0], [0], [1], [0, 0, 1, 1], [], []>} : vector<16x48xf32>, vector<48x96xf32>, vector<16x96xf32> -> vector<16x96xf32>
    %cst_21 = arith.constant 0.000000e+00 : f32
    %36 = vector.broadcast %cst_21 : f32 to vector<16x96xf32>
    %37 = arith.cmpf ogt, %35, %36 : vector<16x96xf32>
    %cst_22 = arith.constant 0.000000e+00 : f32
    %38 = vector.broadcast %cst_22 : f32 to vector<16x96xf32>
    %39 = arith.minimumf %35, %38 : vector<16x96xf32>
    %40 = math.exp %39 : vector<16x96xf32>
    %cst_23 = arith.constant 1.000000e+00 : f32
    %41 = vector.broadcast %cst_23 : f32 to vector<16x96xf32>
    %42 = arith.subf %40, %41 : vector<16x96xf32>
    %43 = arith.select %37, %35, %42 : vector<16x96xi1>, vector<16x96xf32>
    %c0_24 = arith.constant 0 : index
    %c0_25 = arith.constant 0 : index
    %44 = vector.load %arg6[%c0_24, %c0_25] : memref<96x16xf32, #tpu.memory_space<vmem>>, vector<96x16xf32>
    %cst_26 = arith.constant dense<0.000000e+00> : vector<16x16xf32>
    %45 = tpu.matmul %43, %44, %cst_26 {dimension_numbers = #tpu.dot_dimension_numbers<[1], [0], [0], [1], [0, 0, 1, 1], [], []>} : vector<16x96xf32>, vector<96x16xf32>, vector<16x16xf32> -> vector<16x16xf32>
    %c0_27 = arith.constant 0 : index
    %c0_28 = arith.constant 0 : index
    %46 = vector.load %arg7[%c0_27, %c0_28] : memref<1x16xf32, #tpu.memory_space<vmem>>, vector<1x16xf32>
    %47 = vector.broadcast %46 : vector<1x16xf32> to vector<16x16xf32>
    %48 = arith.mulf %45, %47 : vector<16x16xf32>
    %cst_29 = arith.constant dense<0.000000e+00> : vector<16xf32>
    %49 = vector.multi_reduction <add>, %48, %cst_29 [1] : vector<16x16xf32> to vector<16xf32>
    %50 = vector.shape_cast %49 : vector<16xf32> to vector<16x1xf32>
    %c0_30 = arith.constant 0 : index
    %c0_31 = arith.constant 0 : index
    %51 = vector.load %arg8[%c0_30, %c0_31] : memref<1x16xf32, #tpu.memory_space<vmem>>, vector<1x16xf32>
    %cst_32 = arith.constant dense<0.000000e+00> : vector<1x16xf32>
    %52 = tpu.matmul %51, %45, %cst_32 {dimension_numbers = #tpu.dot_dimension_numbers<[1], [1], [0], [0], [0, 0, 1, 0], [], []>} : vector<1x16xf32>, vector<16x16xf32>, vector<1x16xf32> -> vector<1x16xf32>
    %c0_33 = arith.constant 0 : index
    %c0_34 = arith.constant 0 : index
    %53 = vector.load %arg9[%c0_33, %c0_34] : memref<16x16xf32, #tpu.memory_space<vmem>>, vector<16x16xf32>
    %54 = vector.broadcast %50 : vector<16x1xf32> to vector<16x16xf32>
    %55 = vector.broadcast %52 : vector<1x16xf32> to vector<16x16xf32>
    %56 = arith.addf %54, %55 : vector<16x16xf32>
    %cst_35 = arith.constant 0.000000e+00 : f32
    %57 = vector.broadcast %cst_35 : f32 to vector<16x16xf32>
    %58 = arith.cmpf ogt, %56, %57 : vector<16x16xf32>
    %cst_36 = arith.constant 2.000000e-01 : f32
    %59 = vector.broadcast %cst_36 : f32 to vector<16x16xf32>
    %60 = arith.mulf %59, %56 : vector<16x16xf32>
    %61 = arith.select %58, %56, %60 : vector<16x16xi1>, vector<16x16xf32>
    %cst_37 = arith.constant 0.000000e+00 : f32
    %62 = vector.broadcast %cst_37 : f32 to vector<16x16xf32>
    %63 = arith.cmpf ogt, %53, %62 : vector<16x16xf32>
    %cst_38 = arith.constant -9.000000e+15 : f32
    %64 = vector.broadcast %cst_38 : f32 to vector<16x16xf32>
    %65 = arith.select %63, %61, %64 : vector<16x16xi1>, vector<16x16xf32>
    %cst_39 = arith.constant dense<0xFF800000> : vector<16xf32>
    %66 = vector.multi_reduction <maximumf>, %65, %cst_39 [0] : vector<16x16xf32> to vector<16xf32>
    %67 = vector.shape_cast %66 : vector<16xf32> to vector<1x16xf32>
    %68 = vector.broadcast %67 : vector<1x16xf32> to vector<16x16xf32>
    %69 = arith.subf %65, %68 : vector<16x16xf32>
    %70 = math.exp %69 : vector<16x16xf32>
    %cst_40 = arith.constant dense<0.000000e+00> : vector<16xf32>
    %71 = vector.multi_reduction <add>, %70, %cst_40 [0] : vector<16x16xf32> to vector<16xf32>
    %72 = vector.shape_cast %71 : vector<16xf32> to vector<1x16xf32>
    %73 = tpu.reciprocal %72 : vector<1x16xf32> -> vector<1x16xf32>
    %74 = vector.broadcast %73 : vector<1x16xf32> to vector<16x16xf32>
    %75 = arith.mulf %70, %74 : vector<16x16xf32>
    %cst_41 = arith.constant dense<0.000000e+00> : vector<16x16xf32>
    %76 = tpu.matmul %75, %45, %cst_41 {dimension_numbers = #tpu.dot_dimension_numbers<[1], [0], [0], [1], [0, 0, 1, 1], [], []>} : vector<16x16xf32>, vector<16x16xf32>, vector<16x16xf32> -> vector<16x16xf32>
    %cst_42 = arith.constant 0.000000e+00 : f32
    %77 = vector.broadcast %cst_42 : f32 to vector<16x16xf32>
    %78 = arith.cmpf ogt, %76, %77 : vector<16x16xf32>
    %cst_43 = arith.constant 0.000000e+00 : f32
    %79 = vector.broadcast %cst_43 : f32 to vector<16x16xf32>
    %80 = arith.minimumf %76, %79 : vector<16x16xf32>
    %81 = math.exp %80 : vector<16x16xf32>
    %cst_44 = arith.constant 1.000000e+00 : f32
    %82 = vector.broadcast %cst_44 : f32 to vector<16x16xf32>
    %83 = arith.subf %81, %82 : vector<16x16xf32>
    %84 = arith.select %78, %76, %83 : vector<16x16xi1>, vector<16x16xf32>
    %c0_45 = arith.constant 0 : index
    %c0_46 = arith.constant 0 : index
    %85 = vector.load %arg10[%c0_45, %c0_46] : memref<16x16xf32, #tpu.memory_space<vmem>>, vector<16x16xf32>
    tpu.vector_store %arg10[%c0_45, %c0_46], %84 {strides = array<i32>} : memref<16x16xf32, #tpu.memory_space<vmem>>, vector<16x16xf32>,
    return
  }
}

</mosaic_0001>

<bundles_post_ra>
// kernel: tile.9
= control target key start
LH: loop header
LB: loop body
LE: loop exit
PB: predicated region body
PF: predicated region fallthrough
CT: control target
= control target key end

     0   :  { %vm82_vm0 = vcmask 1047556   ;;  %vm84_vm1 = vcmask 130048   ;;  %s172_s9 = smov 16   ;;  %vm103_vm2 = vcmask 392448   ;;  %vm124_vm3 = vcmask 261248   ;;  %s257_s0 = inlined_call_operand.vmem [shape: f32[16,3,16], index: 0, kind: input, shape index: {}]   ;;  %s258_s1 = inlined_call_operand.vmem [shape: f32[16,48], index: 1, kind: output, shape index: {}]  }
   0x1   :  { %v159_v0 = vld [vmem:[%s257_s0 + $0x1c] sm:$0xf]  ;;  %v160_v1 = vld [vmem:[%s257_s0 + $0x18] sm:$0xf]  ;;  %v161_v2 = vld [vmem:[%s257_s0 + $0x14] sm:$0xf] }
   0x2   :  { %48 = vst [vmem:[#allocation0 + $0x38] sm:$0xf] %v159_v0  ;;  %53 = vst [vmem:[#allocation0 + $0x30] sm:$0xf] %v160_v1  ;;  %v162_v3 = vld [vmem:[%s257_s0 + $0x10] sm:$0xf] }
   0x3   :  { %58 = vst [vmem:[#allocation0 + $0x28] sm:$0xf] %v161_v2  ;;  %v163_v4 = vld [vmem:[%s257_s0 + $0xc] sm:$0xf]  ;;  %v164_v5 = vld [vmem:[%s257_s0 + $0x8] sm:$0xf] }
   0x4   :  { %63 = vst [vmem:[#allocation0 + $0x20] sm:$0xf] %v162_v3  ;;  %68 = vst [vmem:[#allocation0 + $0x18] sm:$0xf] %v163_v4  ;;  %v165_v6 = vld [vmem:[%s257_s0 + $0x4] sm:$0xf] }
   0x5   :  { %73 = vst [vmem:[#allocation0 + $0x10] sm:$0xf] %v164_v5  ;;  %v78_v7 = vld [vmem:[%s257_s0] sm:$0xf]  ;;  %77 = vst [vmem:[#allocation0 + $0x8] sm:$0xf] %v165_v6 }
   0x6   :  { %79 = vst [vmem:[#allocation0] sm:$0xf] %v78_v7  ;;  %v151_v8 = vld [vmem:[%s257_s0 + $0x3c] sm:$0xf]  ;;  %v152_v9 = vld [vmem:[%s257_s0 + $0x38] sm:$0xf] }
   0x7   :  { %8 = vst [vmem:[#allocation0 + $0x78] sm:$0xf] %v151_v8  ;;  %13 = vst [vmem:[#allocation0 + $0x70] sm:$0xf] %v152_v9  ;;  %v153_v10 = vld [vmem:[%s257_s0 + $0x34] sm:$0xf] }
   0x8   :  { %v154_v11 = vld [vmem:[%s257_s0 + $0x30] sm:$0xf]  ;;  %v155_v12 = vld [vmem:[%s257_s0 + $0x2c] sm:$0xf]  ;;  %18 = vst [vmem:[#allocation0 + $0x68] sm:$0xf] %v153_v10 }
   0x9   :  { %23 = vst [vmem:[#allocation0 + $0x60] sm:$0xf] %v154_v11  ;;  %28 = vst [vmem:[#allocation0 + $0x58] sm:$0xf] %v155_v12  ;;  %v156_v13 = vld [vmem:[%s257_s0 + $0x28] sm:$0xf] }
   0xa   :  { %v157_v14 = vld [vmem:[%s257_s0 + $0x24] sm:$0xf]  ;;  %v158_v15 = vld [vmem:[%s257_s0 + $0x20] sm:$0xf]  ;;  %33 = vst [vmem:[#allocation0 + $0x50] sm:$0xf] %v156_v13 }
   0xb   :  { %38 = vst [vmem:[#allocation0 + $0x48] sm:$0xf] %v157_v14  ;;  %43 = vst [vmem:[#allocation0 + $0x40] sm:$0xf] %v158_v15  ;;  %s171_s0 = smov 32  }
   0xc   :  { %v98_v16 = vld [vmem:[#allocation0 + $0x2] ss:$8 sm:$0xf0]   ;;  %v119_v17 = vld [vmem:[#allocation0 + $0x1] ss:$8 sm:$0xf0]  }
   0xd   :  { %v96_v18 = vld [vmem:[#allocation0 + $0x2] ss:$8 sm:$0xf]   ;;  %v117_v19 = vld [vmem:[#allocation0 + $0x1] ss:$8 sm:$0xf]  }
   0xe   :  { %v100_v20 = vsel %vm82_vm0, %v98_v16, %v96_v18  ;;  %v121_v21 = vsel %vm82_vm0, %v119_v17, %v117_v19  ;;  %v80_v22 = vld [vmem:[#allocation0] ss:$8 sm:$0xf]  }
   0xf   :  { %v81_v23 = vld [vmem:[#allocation0] ss:$8 sm:$0xf0]   ;;  %101 = vrot.lane.b32.xlu0 %v100_v20, %s171_s0  ;;  %122 = vrot.lane.b32.xlu1 %v121_v21, %s172_s9 }
  0x10   :  { %v108_v24 = vld [vmem:[#allocation0 + $0x42] ss:$8 sm:$0xf0]   ;;  %v129_v25 = vld [vmem:[#allocation0 + $0x41] ss:$8 sm:$0xf0]   ;;  %v83_v26 = vsel %vm82_vm0, %v81_v23, %v80_v22 }
  0x11   :  { %85 = vst.msk [vmem:[%s258_s1] sm:$0xff] %vm84_vm1, %v83_v26   ;;  %v89_v32 = vld [vmem:[#allocation0 + $0x40] ss:$8 sm:$0xf0]  }
  0x12   :  { %v106_v27 = vld [vmem:[#allocation0 + $0x42] ss:$8 sm:$0xf]   ;;  %v127_v28 = vld [vmem:[#allocation0 + $0x41] ss:$8 sm:$0xf]  }
  0x13   :  { %v110_v29 = vsel %vm82_vm0, %v108_v24, %v106_v27  ;;  %v131_v30 = vsel %vm82_vm0, %v129_v25, %v127_v28  ;;  %v87_v31 = vld [vmem:[#allocation0 + $0x40] ss:$8 sm:$0xf]  }
  0x14   :  { %v91_v33 = vsel %vm82_vm0, %v89_v32, %v87_v31  ;;  %111 = vrot.lane.b32.xlu0 %v110_v29, %s171_s0  ;;  %132 = vrot.lane.b32.xlu1 %v131_v30, %s172_s9 }
  0x15   :  { %166 = vst.msk [vmem:[%s258_s1 + $0x8] sm:$0xff] %vm84_vm1, %v91_v33  }
  0x81   :  { %v102_v34 = vpop.permute.xlu0 %101   ;;  %v123_v35 = vpop.permute.xlu1 %122  }
  0x82   :  { %104 = vst.msk [vmem:[%s258_s1] sm:$0xff] %vm103_vm2, %v102_v34  }
  0x83   :  { %125 = vst.msk [vmem:[%s258_s1] sm:$0xff] %vm124_vm3, %v123_v35  }
  0x86   :  { %v112_v36 = vpop.permute.xlu0 %111   ;;  %v133_v37 = vpop.permute.xlu1 %132  }
  0x87   :  { %167 = vst.msk [vmem:[%s258_s1 + $0x8] sm:$0xff] %vm103_vm2, %v112_v36  }
  0x88   :  { %168 = vst.msk [vmem:[%s258_s1 + $0x8] sm:$0xff] %vm124_vm3, %v133_v37  }

// kernel: squeeze.2
= control target key start
LH: loop header
LB: loop body
LE: loop exit
PB: predicated region body
PF: predicated region fallthrough
CT: control target
= control target key end

     0   :  { %vm7_vm0 = vcmask 261120   ;;  %s30_s8 = smov 32   ;;  %vm13_vm1 = vcmask 785920   ;;  %vm19_vm2 = vcmask 523520   ;;  %s47_s0 = inlined_call_operand.vmem [shape: f32[3,32], index: 0, kind: input, shape index: {}]   ;;  %s48_s1 = inlined_call_operand.vmem [shape: f32[1,96], index: 1, kind: output, shape index: {}]  }
   0x1   :  { %v4_v0 = vld [vmem:[%s47_s0] sm:$0xf]  ;;  %s29_s0 = smov 64  }
   0x2   :  { %5 = vst [vmem:[#allocation1] sm:$0xf] %v4_v0 }
   0x9   :  { %v10_v1 = vld [vmem:[#allocation1 + $0x2] sm:$0x1]   ;;  %v6_v2 = vld [vmem:[#allocation1] sm:$0x1]   ;;  %v16_v3 = vld [vmem:[#allocation1 + $0x1] sm:$0x1]  }
   0xa   :  { %11 = vrot.lane.b32.xlu0 %v10_v1, %s29_s0  ;;  %8 = vst.msk [vmem:[#allocation0] sm:$0x1] %vm7_vm0, %v6_v2  }
   0xe   :  { %17 = vrot.lane.b32.xlu0 %v16_v3, %s30_s8 }
  0x7c   :  { %v12_v4 = vpop.permute.xlu0 %11  }
  0x7d   :  { %14 = vst.msk [vmem:[#allocation0] sm:$0x1] %vm13_vm1, %v12_v4  }
  0x80   :  { %v18_v5 = vpop.permute.xlu0 %17  }
  0x81   :  { %20 = vst.msk [vmem:[#allocation0] sm:$0x1] %vm19_vm2, %v18_v5  }
  0x88   :  { %v24_v6 = vld [vmem:[#allocation0] sm:$0x1] }
  0x89   :  { %26 = vst [vmem:[%s48_s1] sm:$0x1] %v24_v6 }

// kernel: intra_domain_forward.1
= control target key start
LH: loop header
LB: loop body
LE: loop exit
PB: predicated region body
PF: predicated region fallthrough
CT: control target
= control target key end

     0   :  { %vm54_vm0 = vcmask 785408   ;;  %s1557_s0 = inlined_call_operand.vmem [shape: f32[48,96], index: 0, kind: input, shape index: {}]   ;;  %s1558_s1 = inlined_call_operand.vmem [shape: f32[96,96], index: 1, kind: input, shape index: {}]   ;;  %s1559_s2 = inlined_call_operand.vmem [shape: f32[1,96], index: 2, kind: input, shape index: {}]   ;;  %s1560_s3 = inlined_call_operand.vmem [shape: f32[1,96], index: 3, kind: input, shape index: {}]   ;;  %s1561_s4 = inlined_call_operand.vmem [shape: f32[48,48], index: 4, kind: input, shape index: {}]   ;;  %s1562_s5 = inlined_call_operand.vmem [shape: f32[16,48], index: 5, kind: input, shape index: {}]   ;;  %s1563_s6 = inlined_call_operand.vmem [shape: f32[96,16], index: 6, kind: input, shape index: {}]   ;;  %s1564_s7 = inlined_call_operand.vmem [shape: f32[1,16], index: 7, kind: input, shape index: {}]   ;;  %s1565_s8 = inlined_call_operand.vmem [shape: f32[1,16], index: 8, kind: input, shape index: {}]   ;;  %s1566_s9 = inlined_call_operand.vmem [shape: f32[16,16], index: 9, kind: input, shape index: {}]   ;;  %s1567_s10 = inlined_call_operand.hbm [shape: f32[16,16], index: 10, kind: output, shape index: {}]  }
   0x1   :  { %v42_v0 = vld [vmem:[%s1558_s1] sm:$0xff]  ;;  %v43_v1 = vld [vmem:[%s1558_s1 + $0x8] sm:$0xff]  ;;  %v44_v2 = vld [vmem:[%s1558_s1 + $0x10] sm:$0xff] }
   0x2   :  { %v1129_v3 = vpack.c.bf16 %v43_v1, %v42_v0  ;;  %v45_v4 = vld [vmem:[%s1558_s1 + $0x18] sm:$0xff]  ;;  %v46_v6 = vld [vmem:[%s1558_s1 + $0x20] sm:$0xff]  ;;  %v47_v7 = vld [vmem:[%s1558_s1 + $0x28] sm:$0xff] }
   0x3   :  { %v1133_v5 = vpack.c.bf16 %v45_v4, %v44_v2  ;;  %v36_v8 = vld [vmem:[%s1557_s0] sm:$0xff]  ;;  %v1137_v9 = vpack.c.bf16 %v47_v7, %v46_v6  ;;  %v48_v10 = vld [vmem:[%s1558_s1 + $0x30] sm:$0xff]  ;;  %v49_v11 = vld [vmem:[%s1558_s1 + $0x38] sm:$0xff] }
   0x4   :  { %1130 = vmatprep.subr.bf16.mxu0 %v1129_v3  ;;  %1034 = vmatprep.mubr.msk.f32.mxu0 %vm54_vm0, %v36_v8 }
   0x5   :  { %1132 = vmatpush3.bf16.msra.mxu0 %v1129_v3 }
   0x6   :  { %1134 = vmatprep.subr.bf16.mxu0 %v1133_v5 }
   0x7   :  { %15 = vsyncpa [#allocation3], 0  ;;  %v1141_v12 = vpack.c.bf16 %v49_v11, %v48_v10  ;;  %v50_v13 = vld [vmem:[%s1558_s1 + $0x40] sm:$0xff]  ;;  %v51_v14 = vld [vmem:[%s1558_s1 + $0x48] sm:$0xff]  ;;  %v1279_v24 = vmov 0.0|0.0   ;;  %vm1280_vm1 = vmmov 0   ;;  %v297_v51 = vlaneseq }
   0x8   :  { %v1145_v15 = vpack.c.bf16 %v51_v14, %v50_v13  ;;  %v52_v16 = vld [vmem:[%s1558_s1 + $0x50] sm:$0xff]  ;;  %v53_v17 = vld [vmem:[%s1558_s1 + $0x58] sm:$0xff]  ;;  %v37_v19 = vld [vmem:[%s1557_s0 + $0x8] sm:$0xff]  ;;  %1153 = vmatprep.subr.bf16.mxu1 %v1279_v24  ;;  %v1281_v25 = vmov 0.0   ;;  %vm337_vm3 = vcmask 392192  }
   0x9   :  { %1136 = vmatpush3.bf16.msra.mxu0 %v1133_v5  ;;  %v1149_v18 = vpack.c.bf16 %v53_v17, %v52_v16  ;;  %v38_v20 = vld [vmem:[%s1557_s0 + $0x10] sm:$0xff]  ;;  %v39_v21 = vld [vmem:[%s1557_s0 + $0x18] sm:$0xff]  ;;  %v40_v22 = vld [vmem:[%s1557_s0 + $0x20] sm:$0xff]  ;;  %1055 = vmatprep.mubr.msk.f32.mxu1 %vm1280_vm1, %v1281_v25  ;;  %v1431_v54 = vshrl.u32 %v297_v51, 7 }
   0xa   :  { %1138 = vmatprep.subr.bf16.mxu0 %v1137_v9  ;;  %v41_v23 = vld [vmem:[%s1557_s0 + $0x28] sm:$0xff]  ;;  %v924_v26 = vld [vmem:[%s1559_s2] ss:$0 sm:$0xff]  ;;  %vm1407_vm2 = vmpackc.low %vm54_vm0, %vm54_vm0 }
   0xb   :  { %v199_v49 = vld [vmem:[%s1560_s3] sm:$0x1]  ;;  %v299_v57 = vsub.s32 0, %v1431_v54  ;;  %v293_v58 = vld [vmem:[%s1561_s4 + $0x10] sm:$0xff]  ;;  %v294_v59 = vld [vmem:[%s1561_s4 + $0x18] sm:$0xff] }
   0xc   :  { %v397_v50 = vld [vmem:[%s1562_s5] sm:$0xff]  ;;  %v292_v61 = vld [vmem:[%s1561_s4 + $0x8] sm:$0xff]  ;;  %vm327_vm4 = vcmp.gt.f32.partialorder %v293_v58, 0.0  ;;  %vm328_vm5 = vcmp.gt.f32.partialorder %v294_v59, 0.0 }
   0xd   :  { %1140 = vmatpush3.bf16.msra.mxu0 %v1137_v9  ;;  %v291_v60 = vld [vmem:[%s1561_s4] sm:$0xff]  ;;  %v296_v2 = vld [vmem:[%s1561_s4 + $0x28] sm:$0xff]  ;;  %vm326_vm7 = vcmp.gt.f32.partialorder %v292_v61, 0.0 }
   0xe   :  { %1142 = vmatprep.subr.bf16.mxu0 %v1141_v12  ;;  %v295_v1 = vld [vmem:[%s1561_s4 + $0x20] sm:$0xff]  ;;  %vm325_vm6 = vcmp.gt.f32.partialorder %v291_v60, 0.0  ;;  %vm330_vm9 = vcmp.gt.f32.partialorder %v296_v2, 0.0 }
   0xf   :  { %vm329_vm8 = vcmp.gt.f32.partialorder %v295_v1, 0.0 }
  0x11   :  { %1144 = vmatpush3.bf16.msra.mxu0 %v1141_v12 }
  0x12   :  { %1146 = vmatprep.subr.bf16.mxu0 %v1145_v15 }
  0x15   :  { %1148 = vmatpush3.bf16.msra.mxu0 %v1145_v15 }
  0x16   :  { %1150 = vmatprep.subr.bf16.mxu0 %v1149_v18 }
  0x19   :  { %1152 = vmatpush3.bf16.msra.mxu0 %v1149_v18 }
  0x1c   :  { %1035 = vmatmul.mubr.msk.f32.vlgmr.msra.gmra.mrb[0].mxu0 %vm54_vm0, %v37_v19 }
  0x1d   :  { %1037 = vmatprep.mubr.msk.f32.mxu0 %vm54_vm0, %v38_v20 }
  0x20   :  { %1038 = vmatmul.mubr.msk.f32.gmra.mrb[2].mxu0 %vm54_vm0, %v39_v21 }
  0x21   :  { %1040 = vmatprep.mubr.msk.f32.mxu0 %vm54_vm0, %v40_v22 }
  0x24   :  { %1041 = vmatmul.mubr.msk.f32.gmra.mrb[4].mxu0 %vm54_vm0, %v41_v23 }
  0x25   :  { %1070 = vmatprep.mubr.msk.f32.mxu0 %vm337_vm3, %v397_v50 }
  0xef   :  { %v1036_v27 = vpop.f32.mrb[0].mxu0 }
  0xf0   :  { %v139_v28 = vpop.f32.mrb[1].mxu0  ;;  %v176_v29 = vmul.f32 %v1036_v27, %v924_v26 }
  0xf1   :  { %v1154_v31 = vpack.c.bf16 %v1036_v27, %v139_v28  ;;  %v175_v32 = vmul.f32 %v924_v26, %v139_v28 }
  0xf2   :  { %v184_v33 = vsel %vm54_vm0, %v176_v29, 0.0 }
  0xf3   :  { %185 = vadd.xlane.f32.xlu0 %v184_v33  ;;  %1156 = vmatpush3.bf16.xpose.msk.msra.mxu1 %vm1407_vm2, %v1154_v31  ;;  %v1039_v34 = vpop.f32.mrb[2].mxu0  ;;  %v181_v38 = vsel %vm54_vm0, %v175_v32, 0.0 }
  0xf4   :  { %v149_v35 = vpop.f32.mrb[3].mxu0  ;;  %1157 = vmatprep.subr.bf16.mxu1 %v1279_v24  ;;  %v178_v47 = vmul.f32 %v1039_v34, %v924_v26 }
  0xf5   :  { %v177_v36 = vmul.f32 %v924_v26, %v149_v35  ;;  %v1158_v37 = vpack.c.bf16 %v1039_v34, %v149_v35 }
  0xf6   :  { %v190_v48 = vsel %vm54_vm0, %v178_v47, 0.0 }
  0xf7   :  { %182 = vadd.xlane.f32.xlu0 %v181_v38  ;;  %v1042_v39 = vpop.f32.mrb[4].mxu0  ;;  %v187_v40 = vsel %vm54_vm0, %v177_v36, 0.0 }
  0xf8   :  { %v180_v41 = vmul.f32 %v1042_v39, %v924_v26  ;;  %v159_v42 = vpop.f32.mrb[5].mxu0 }
  0xf9   :  { %v179_v43 = vmul.f32 %v924_v26, %v159_v42  ;;  %v1162_v44 = vpack.c.bf16 %v1042_v39, %v159_v42 }
  0xfa   :  { %v196_v45 = vsel %vm54_vm0, %v180_v41, 0.0 }
  0xfb   :  { %1160 = vmatpush3.bf16.xpose.msk.msra.mxu1 %vm1407_vm2, %v1158_v37  ;;  %188 = vadd.xlane.f32.xlu0 %v187_v40  ;;  %v193_v46 = vsel %vm54_vm0, %v179_v43, 0.0 }
  0xfc   :  { %197 = vadd.xlane.f32.xlu1 %v196_v45  ;;  %1161 = vmatprep.subr.bf16.mxu1 %v1279_v24 }
 0x100   :  { %194 = vadd.xlane.f32.xlu1 %v193_v46 }
 0x103   :  { %1164 = vmatpush3.bf16.xpose.msk.msra.mxu1 %vm1407_vm2, %v1162_v44 }
 0x104   :  { %191 = vadd.xlane.f32.xlu1 %v190_v48  ;;  %1178 = vmatprep.subr.bf16.mxu1 %v1154_v31 }
 0x10a   :  { %1056 = vmatmul.mubr.msk.f32.vlgmr.msra.gmra.mrb[0].mxu1 %vm54_vm0, %v199_v49 }
 0x10b   :  { %1180 = vmatpush3.bf16.msra.mxu1 %v1154_v31 }
 0x10c   :  { %1182 = vmatprep.subr.bf16.mxu1 %v1158_v37 }
 0x10f   :  { %1184 = vmatpush3.bf16.msra.mxu1 %v1158_v37 }
 0x110   :  { %1186 = vmatprep.subr.bf16.mxu1 %v1162_v44 }
 0x113   :  { %1188 = vmatpush3.bf16.msra.mxu1 %v1162_v44 }
 0x114   :  { %1213 = vmatprep.subr.bf16.mxu1 %v1279_v24 }
 0x180   :  { %v186_v52 = vpop.xlane.xlu0 %185 }
 0x184   :  { %v183_v55 = vpop.xlane.xlu0 %182 }
 0x188   :  { %v189_v3 = vpop.xlane.xlu0 %188 }
 0x189   :  { %v198_v53 = vpop.xlane.xlu1 %197 }
 0x18d   :  { %v195_v56 = vpop.xlane.xlu1 %194 }
 0x191   :  { %v192_v4 = vpop.xlane.xlu1 %191 }
 0x1dd   :  { %v287_v62 = vpop.f32.mrb[0].mxu1 }
 0x1de   :  { %v300_v63 = vrot.slane %v287_v62, %v299_v57  ;;  %v1057_v0 = vpop.f32.mrb[1].mxu1 }
 0x1e0   :  { %v301_v5 = vadd.f32 %v300_v63, %v183_v55  ;;  %v302_v6 = vadd.f32 %v300_v63, %v186_v52  ;;  %v303_v7 = vadd.f32 %v300_v63, %v189_v3  ;;  %v304_v8 = vadd.f32 %v300_v63, %v192_v4 }
 0x1e1   :  { %v305_v9 = vadd.f32 %v300_v63, %v195_v56  ;;  %v306_v10 = vadd.f32 %v300_v63, %v198_v53 }
 0x1e2   :  { %vm309_vm10 = vcmp.gt.f32.partialorder %v303_v7, 0.0  ;;  %vm310_vm11 = vcmp.gt.f32.partialorder %v304_v8, 0.0  ;;  %v313_v11 = vmul.f32 0.2, %v301_v5  ;;  %v314_v12 = vmul.f32 0.2, %v302_v6 }
 0x1e3   :  { %vm311_vm12 = vcmp.gt.f32.partialorder %v305_v9, 0.0  ;;  %vm312_vm13 = vcmp.gt.f32.partialorder %v306_v10, 0.0  ;;  %v315_v13 = vmul.f32 0.2, %v303_v7  ;;  %v316_v14 = vmul.f32 0.2, %v304_v8 }
 0x1e4   :  { %v317_v15 = vmul.f32 0.2, %v305_v9  ;;  %v318_v16 = vmul.f32 0.2, %v306_v10  ;;  %vm307_vm14 = vcmp.gt.f32.partialorder %v301_v5, 0.0  ;;  %vm308_vm15 = vcmp.gt.f32.partialorder %v302_v6, 0.0 }
 0x1e5   :  { %v321_v17 = vsel %vm309_vm10, %v303_v7, %v315_v13  ;;  %v322_v18 = vsel %vm310_vm11, %v304_v8, %v316_v14  ;;  %v319_v19 = vsel %vm307_vm14, %v301_v5, %v313_v11  ;;  %v320_v20 = vsel %vm308_vm15, %v302_v6, %v314_v12 }
 0x1e6   :  { %v323_v21 = vsel %vm311_vm12, %v305_v9, %v317_v15  ;;  %v324_v22 = vsel %vm312_vm13, %v306_v10, %v318_v16  ;;  %v333_v23 = vsel %vm327_vm4, %v321_v17, -9e+15  ;;  %v334_v24 = vsel %vm328_vm5, %v322_v18, -9e+15 }
 0x1e7   :  { %v331_v26 = vsel %vm325_vm6, %v319_v19, -9e+15  ;;  %v332_v27 = vsel %vm326_vm7, %v320_v20, -9e+15  ;;  %v340_v28 = vsel %vm337_vm3, %v333_v23, -inf  ;;  %v341_v32 = vsel %vm337_vm3, %v334_v24, -inf }
 0x1e8   :  { %v335_v29 = vsel %vm329_vm8, %v323_v21, -9e+15  ;;  %v336_v30 = vsel %vm330_vm9, %v324_v22, -9e+15  ;;  %v338_v31 = vsel %vm337_vm3, %v331_v26, -inf  ;;  %v339_v33 = vsel %vm337_vm3, %v332_v27, -inf }
 0x1e9   :  { %v342_v34 = vsel %vm337_vm3, %v335_v29, -inf  ;;  %v344_v35 = vsel %vm337_vm3, %v336_v30, -inf  ;;  %v347_v38 = vmax.f32 %v340_v28, %v341_v32  ;;  %v573_v32 = vld [vmem:[%s1563_s6] sm:$0xff] }
 0x1ea   :  { %v343_v36 = vmax.f32 %v338_v31, %v342_v34  ;;  %v345_v37 = vmax.f32 %v339_v33, %v344_v35  ;;  %v398_v31 = vld [vmem:[%s1562_s5 + $0x8] sm:$0xff] }
 0x1eb   :  { %v574_v33 = vld [vmem:[%s1563_s6 + $0x8] sm:$0xff] }
 0x1ec   :  { %v346_v39 = vmax.f32 %v343_v36, %v345_v37  ;;  %v1189_v34 = vpack.c.bf16 %v574_v33, %v573_v32  ;;  %v575_v37 = vld [vmem:[%s1563_s6 + $0x10] sm:$0xff] }
 0x1ee   :  { %v348_v40 = vmax.f32 %v346_v39, %v347_v38  ;;  %v576_v38 = vld [vmem:[%s1563_s6 + $0x18] sm:$0xff] }
 0x1ef   :  { %v1193_v39 = vpack.c.bf16 %v576_v38, %v575_v37 }
 0x1f0   :  { %v349_v41 = vrot.slane %v348_v40, 4 }
 0x1f2   :  { %v350_v42 = vmax.f32 %v348_v40, %v349_v41  ;;  %v577_v40 = vld [vmem:[%s1563_s6 + $0x20] sm:$0xff]  ;;  %v578_v41 = vld [vmem:[%s1563_s6 + $0x28] sm:$0xff] }
 0x1f4   :  { %v351_v43 = vrot.slane %v350_v42, 2 }
 0x1f6   :  { %v352_v44 = vmax.f32 %v350_v42, %v351_v43  ;;  %v579_v42 = vld [vmem:[%s1563_s6 + $0x30] sm:$0xff]  ;;  %v580_v43 = vld [vmem:[%s1563_s6 + $0x38] sm:$0xff] }
 0x1f8   :  { %v353_v45 = vrot.slane %v352_v44, 1 }
 0x1fa   :  { %v354_v46 = vmax.f32 %v352_v44, %v353_v45  ;;  %v1201_v44 = vpack.c.bf16 %v580_v43, %v579_v42  ;;  %v581_v45 = vld [vmem:[%s1563_s6 + $0x40] sm:$0xff] }
 0x1fc   :  { %v355_v47 = vsub.f32 %v331_v26, %v354_v46  ;;  %v356_v48 = vsub.f32 %v332_v27, %v354_v46  ;;  %v357_v49 = vsub.f32 %v333_v23, %v354_v46  ;;  %v358_v50 = vsub.f32 %v334_v24, %v354_v46 }
 0x1fd   :  { %v359_v51 = vsub.f32 %v335_v29, %v354_v46  ;;  %v360_v56 = vsub.f32 %v336_v30, %v354_v46  ;;  %v582_v46 = vld [vmem:[%s1563_s6 + $0x48] sm:$0xff] }
 0x1fe   :  { %v361_v52 = vmul.f32 1.442695, %v355_v47  ;;  %v363_v53 = vmul.f32 1.442695, %v356_v48  ;;  %v365_v55 = vmul.f32 1.442695, %v357_v49  ;;  %v1205_v47 = vpack.c.bf16 %v582_v46, %v581_v45 }
 0x1ff   :  { %v367_v58 = vmul.f32 1.442695, %v358_v50  ;;  %v369_v59 = vmul.f32 1.442695, %v359_v51  ;;  %v371_v60 = vmul.f32 1.442695, %v360_v56 }
 0x200   :  { %1227 = vpow2.f32 %v361_v52  ;;  %v583_v48 = vld [vmem:[%s1563_s6 + $0x50] sm:$0xff]  ;;  %v584_v49 = vld [vmem:[%s1563_s6 + $0x58] sm:$0xff] }
 0x201   :  { %1229 = vpow2.f32 %v363_v53  ;;  %v1209_v50 = vpack.c.bf16 %v584_v49, %v583_v48 }
 0x202   :  { %1231 = vpow2.f32 %v365_v55 }
 0x203   :  { %1233 = vpow2.f32 %v367_v58 }
 0x204   :  { %1235 = vpow2.f32 %v369_v59 }
 0x205   :  { %1237 = vpow2.f32 %v371_v60 }
 0x20a   :  { %v1228_v61 = vpop.eup %1227 }
 0x20b   :  { %v1230_v62 = vpop.eup %1229  ;;  %v373_v63 = vsel %vm337_vm3, %v1228_v61, 0.0 }
 0x20c   :  { %v1232_v0 = vpop.eup %1231  ;;  %v374_v1 = vsel %vm337_vm3, %v1230_v62, 0.0 }
 0x20d   :  { %v1234_v2 = vpop.eup %1233  ;;  %v375_v3 = vadd.f32 %v374_v1, %v373_v63  ;;  %v376_v4 = vsel %vm337_vm3, %v1232_v0, 0.0  ;;  %v940_v1 = vld [vmem:[%s1564_s7] ss:$0 sm:$0xff] }
 0x20e   :  { %v1236_v5 = vpop.eup %1235  ;;  %v378_v7 = vsel %vm337_vm3, %v1234_v2, 0.0 }
 0x20f   :  { %v377_v6 = vadd.f32 %v376_v4, %v375_v3  ;;  %v1238_v8 = vpop.eup %1237  ;;  %v380_v10 = vsel %vm337_vm3, %v1236_v5, 0.0 }
 0x210   :  { %v382_v12 = vsel %vm337_vm3, %v1238_v8, 0.0 }
 0x211   :  { %v379_v9 = vadd.f32 %v378_v7, %v377_v6 }
 0x213   :  { %v381_v11 = vadd.f32 %v380_v10, %v379_v9  ;;  %v682_v9 = vld [vmem:[%s1565_s8] sm:$0x1]  ;;  %s1282_s8 = smov [#allocation2]  }
 0x215   :  { %v383_v13 = vadd.f32 %v382_v12, %v381_v11  ;;  %v762_v11 = vld [vmem:[%s1566_s9] sm:$0xff]  ;;  %v763_v12 = vld [vmem:[%s1566_s9 + $0x8] sm:$0xff]  ;;  %s907_s9 = sshll.u32 %s1282_s8, 4  ;;  %s908_s9 = int_to_ptr.vmem [resolvable:$true] %s907_s9 }
 0x216   :  { %vm777_vm5 = vcmp.gt.f32.partialorder %v763_v12, 0.0  ;;  %s1255_s5 = scalar_lea.vmem %s908_s9, 256  ;;  %p1260_p1 = scmp.lt.s32.totalorder %s908_s9, %s908_s9 }
 0x217   :  { %v384_v14 = vrot.slane %v383_v13, 4  ;;  %p1256_p0 = scmp.ne.s32.totalorder %s908_s9, %s1255_s5  ;;  %p1261_p2 = scmp.lt.s32.totalorder %s1255_s5, %s1255_s5 }
 0x219   :  { %v385_v15 = vadd.f32 %v384_v14, %v383_v13  ;;  %p1262_p3 = por %p1261_p2, %p1260_p1 }
 0x21b   :  { %v386_v16 = vrot.slane %v385_v15, 2  ;;  %p1263_p4 = pnand %p1262_p3, %p1256_p0 }
 0x21d   :  { %v387_v17 = vadd.f32 %v386_v16, %v385_v15 }
 0x21f   :  { %v388_v18 = vrot.slane %v387_v17, 1 }
 0x221   :  { %v389_v19 = vadd.f32 %v388_v18, %v387_v17 }
 0x223   :  { %1239 = vrcp.f32 %v389_v19 }
 0x22d   :  { %v1240_v20 = vpop.eup %1239 }
 0x22e   :  { %v391_v21 = vmul.f32 %v1240_v20, %v1228_v61  ;;  %v392_v22 = vmul.f32 %v1240_v20, %v1230_v62  ;;  %v393_v23 = vmul.f32 %v1240_v20, %v1232_v0  ;;  %v394_v24 = vmul.f32 %v1240_v20, %v1234_v2 }
 0x22f   :  { %v395_v28 = vmul.f32 %v1240_v20, %v1236_v5  ;;  %v396_v29 = vmul.f32 %v1240_v20, %v1238_v8 }
 0x230   :  { %v1165_v26 = vpack.c.bf16 %v392_v22, %v391_v21  ;;  %v1169_v27 = vpack.c.bf16 %v394_v24, %v393_v23 }
 0x231   :  { %v1173_v30 = vpack.c.bf16 %v396_v29, %v395_v28 }
 0x232   :  { %1166 = vmatprep.subr.bf16.mxu0 %v1165_v26 }
 0x233   :  { %1168 = vmatpush3.bf16.msra.mxu0 %v1165_v26 }
 0x234   :  { %1170 = vmatprep.subr.bf16.mxu0 %v1169_v27 }
 0x237   :  { %1172 = vmatpush3.bf16.msra.mxu0 %v1169_v27 }
 0x238   :  { %1174 = vmatprep.subr.bf16.mxu0 %v1173_v30 }
 0x23b   :  { %1176 = vmatpush3.bf16.msra.mxu0 %v1173_v30 }
 0x23c   :  { %1190 = vmatprep.subr.bf16.mxu0 %v1189_v34 }
 0x23e   :  { %1071 = vmatmul.mubr.msk.f32.vlgmr.msra.gmra.mrb[6].mxu0 %vm337_vm3, %v398_v31 }
 0x23f   :  { %1192 = vmatpush3.bf16.msra.mxu0 %v1189_v34 }
 0x240   :  { %1194 = vmatprep.subr.bf16.mxu0 %v1193_v39 }
 0x243   :  { %1196 = vmatpush3.bf16.msra.mxu0 %v1193_v39 }
 0x311   :  { %v1072_v35 = vpop.f32.mrb[6].mxu0 }
 0x312   :  { %v471_v36 = vpop.f32.mrb[7].mxu0 }
 0x313   :  { %1085 = vmatprep.mubr.msk.f32.mxu1 %vm337_vm3, %v471_v36 }
 0x314   :  { %1086 = vmatmul.mubr.msk.f32.vlgmr.msra.gmra.mrb[2].mxu1 %vm337_vm3, %v1072_v35  ;;  %vm675_vm3 = vcmask 130048  }
 0x315   :  { %1119 = vmatprep.mubr.msk.f32.mxu1 %vm1280_vm1, %v1281_v25  ;;  %v1197_v25 = vpack.c.bf16 %v578_v41, %v577_v40  ;;  %vm1215_vm4 = vmpackc.low %vm675_vm3, %vm675_vm3 }
 0x317   :  { %1198 = vmatprep.subr.bf16.mxu0 %v1197_v25 }
 0x318   :  { %1200 = vmatpush3.bf16.msra.mxu0 %v1197_v25 }
 0x319   :  { %1202 = vmatprep.subr.bf16.mxu0 %v1201_v44 }
 0x31c   :  { %1204 = vmatpush3.bf16.msra.mxu0 %v1201_v44 }
 0x31d   :  { %1206 = vmatprep.subr.bf16.mxu0 %v1205_v47 }
 0x320   :  { %1208 = vmatpush3.bf16.msra.mxu0 %v1205_v47 }
 0x321   :  { %1210 = vmatprep.subr.bf16.mxu0 %v1209_v50 }
 0x324   :  { %1212 = vmatpush3.bf16.msra.mxu0 %v1209_v50 }
 0x3e7   :  { %v1087_v51 = vpop.f32.mrb[2].mxu1 }
 0x3e8   :  { %v564_v52 = vmin.f32 %v1087_v51, 0.0  ;;  %v552_v53 = vpop.f32.mrb[3].mxu1  ;;  %vm562_vm2 = vcmp.gt.f32.partialorder %v1087_v51, 0.0 }
 0x3e9   :  { %v563_v55 = vmin.f32 %v552_v53, 0.0  ;;  %vm561_vm1 = vcmp.gt.f32.partialorder %v552_v53, 0.0 }
 0x3ea   :  { %v567_v56 = vmul.f32 1.442695, %v564_v52 }
 0x3eb   :  { %v565_v58 = vmul.f32 1.442695, %v563_v55 }
 0x3ec   :  { %1241 = vpow2.f32 %v567_v56 }
 0x3ed   :  { %1243 = vpow2.f32 %v565_v58 }
 0x3f6   :  { %v1242_v59 = vpop.eup %1241 }
 0x3f7   :  { %v1244_v60 = vpop.eup %1243  ;;  %v937_v61 = vadd.f32 -1.0, %v1242_v59 }
 0x3f8   :  { %v936_v62 = vadd.f32 -1.0, %v1244_v60 }
 0x3f9   :  { %v572_v0 = vsel %vm562_vm2, %v1087_v51, %v937_v61 }
 0x3fa   :  { %v571_v63 = vsel %vm561_vm1, %v552_v53, %v936_v62 }
 0x3fb   :  { %1112 = vmatprep.mubr.msk.f32.mxu0 %vm54_vm0, %v571_v63 }
 0x3fc   :  { %1113 = vmatmul.mubr.msk.f32.vlgmr.msra.gmra.mrb[8].mxu0 %vm54_vm0, %v572_v0  ;;  %vm776_vm0 = vcmp.gt.f32.partialorder %v762_v11, 0.0 }
 0x4cf   :  { %v1114_v2 = vpop.f32.mrb[8].mxu0 }
 0x4d0   :  { %v657_v3 = vpop.f32.mrb[9].mxu0  ;;  %v674_v4 = vmul.f32 %v1114_v2, %v940_v1 }
 0x4d1   :  { %v673_v5 = vmul.f32 %v940_v1, %v657_v3  ;;  %v1214_v6 = vpack.c.bf16 %v1114_v2, %v657_v3 }
 0x4d2   :  { %v679_v7 = vsel %vm675_vm3, %v674_v4, 0.0 }
 0x4d3   :  { %680 = vadd.xlane.f32.xlu1 %v679_v7  ;;  %1216 = vmatpush3.bf16.xpose.msk.msra.mxu1 %vm1215_vm4, %v1214_v6  ;;  %v676_v8 = vsel %vm675_vm3, %v673_v5, 0.0 }
 0x4d4   :  { %1218 = vmatprep.subr.bf16.mxu1 %v1214_v6  ;;  %677 = vadd.xlane.f32.xlu0 %v676_v8 }
 0x4da   :  { %1120 = vmatmul.mubr.msk.f32.vlgmr.msra.gmra.mrb[4].mxu1 %vm675_vm3, %v682_v9 }
 0x4db   :  { %1220 = vmatpush3.bf16.msra.mxu1 %v1214_v6 }
 0x560   :  { %v681_v15 = vpop.xlane.xlu1 %680 }
 0x561   :  { %v678_v16 = vpop.xlane.xlu0 %677 }
 0x5ad   :  { %v758_v10 = vpop.f32.mrb[4].mxu1 }
 0x5ae   :  { %v767_v13 = vrot.slane %v758_v10, %v299_v57  ;;  %v1121_v14 = vpop.f32.mrb[5].mxu1 }
 0x5b0   :  { %v768_v17 = vadd.f32 %v767_v13, %v678_v16  ;;  %v769_v18 = vadd.f32 %v767_v13, %v681_v15 }
 0x5b2   :  { %vm770_vm6 = vcmp.gt.f32.partialorder %v768_v17, 0.0  ;;  %vm771_vm7 = vcmp.gt.f32.partialorder %v769_v18, 0.0  ;;  %v772_v19 = vmul.f32 0.2, %v768_v17  ;;  %v773_v20 = vmul.f32 0.2, %v769_v18 }
 0x5b4   :  { %v774_v21 = vsel %vm770_vm6, %v768_v17, %v772_v19  ;;  %v775_v22 = vsel %vm771_vm7, %v769_v18, %v773_v20 }
 0x5b5   :  { %v778_v23 = vsel %vm776_vm0, %v774_v21, -9e+15  ;;  %v779_v24 = vsel %vm777_vm5, %v775_v22, -9e+15 }
 0x5b6   :  { %v780_v26 = vsel %vm675_vm3, %v778_v23, -inf  ;;  %v781_v54 = vsel %vm675_vm3, %v779_v24, -inf }
 0x5b7   :  { %v782_v57 = vmax.f32 %v780_v26, %v781_v54 }
 0x5b9   :  { %v783_v27 = vrot.slane %v782_v57, 4 }
 0x5bb   :  { %v784_v28 = vmax.f32 %v782_v57, %v783_v27 }
 0x5bd   :  { %v785_v29 = vrot.slane %v784_v28, 2 }
 0x5bf   :  { %v786_v30 = vmax.f32 %v784_v28, %v785_v29 }
 0x5c1   :  { %v787_v31 = vrot.slane %v786_v30, 1 }
 0x5c3   :  { %v788_v32 = vmax.f32 %v786_v30, %v787_v31 }
 0x5c5   :  { %v789_v33 = vsub.f32 %v778_v23, %v788_v32  ;;  %v790_v34 = vsub.f32 %v779_v24, %v788_v32 }
 0x5c7   :  { %v791_v35 = vmul.f32 1.442695, %v789_v33  ;;  %v793_v36 = vmul.f32 1.442695, %v790_v34 }
 0x5c9   :  { %1245 = vpow2.f32 %v791_v35 }
 0x5ca   :  { %1247 = vpow2.f32 %v793_v36 }
 0x5d3   :  { %v1246_v37 = vpop.eup %1245 }
 0x5d4   :  { %v1248_v38 = vpop.eup %1247  ;;  %v795_v39 = vsel %vm675_vm3, %v1246_v37, 0.0 }
 0x5d5   :  { %v796_v40 = vsel %vm675_vm3, %v1248_v38, 0.0 }
 0x5d6   :  { %v797_v41 = vadd.f32 %v796_v40, %v795_v39 }
 0x5d8   :  { %v798_v25 = vrot.slane %v797_v41, 4 }
 0x5da   :  { %v799_v42 = vadd.f32 %v798_v25, %v797_v41 }
 0x5dc   :  { %v800_v43 = vrot.slane %v799_v42, 2 }
 0x5de   :  { %v801_v44 = vadd.f32 %v800_v43, %v799_v42 }
 0x5e0   :  { %v802_v45 = vrot.slane %v801_v44, 1 }
 0x5e2   :  { %v803_v46 = vadd.f32 %v802_v45, %v801_v44 }
 0x5e4   :  { %1249 = vrcp.f32 %v803_v46 }
 0x5ee   :  { %v1250_v47 = vpop.eup %1249 }
 0x5ef   :  { %v805_v48 = vmul.f32 %v1250_v47, %v1246_v37  ;;  %v806_v49 = vmul.f32 %v1250_v47, %v1248_v38 }
 0x5f1   :  { %1126 = vmatprep.mubr.msk.f32.mxu1 %vm675_vm3, %v805_v48 }
 0x5f2   :  { %1127 = vmatmul.mubr.msk.f32.vlgmr.msra.gmra.mrb[6].mxu1 %vm675_vm3, %v806_v49 }
 0x6c5   :  { %v1128_v50 = vpop.f32.mrb[6].mxu1 }
 0x6c6   :  { %v891_v51 = vmin.f32 %v1128_v50, 0.0  ;;  %v879_v52 = vpop.f32.mrb[7].mxu1  ;;  %vm889_vm8 = vcmp.gt.f32.partialorder %v1128_v50, 0.0 }
 0x6c7   :  { %v890_v53 = vmin.f32 %v879_v52, 0.0  ;;  %vm888_vm9 = vcmp.gt.f32.partialorder %v879_v52, 0.0 }
 0x6c8   :  { %v894_v55 = vmul.f32 1.442695, %v891_v51 }
 0x6c9   :  { %v892_v56 = vmul.f32 1.442695, %v890_v53 }
 0x6ca   :  { %1251 = vpow2.f32 %v894_v55 }
 0x6cb   :  { %1253 = vpow2.f32 %v892_v56 }
 0x6d4   :  { %v1252_v58 = vpop.eup %1251 }
 0x6d5   :  { %v1254_v59 = vpop.eup %1253  ;;  %v947_v60 = vadd.f32 -1.0, %v1252_v58 }
 0x6d6   :  { %v946_v61 = vadd.f32 -1.0, %v1254_v59 }
 0x6d7   :  { %v899_v62 = vsel %vm889_vm8, %v1128_v50, %v947_v60 }
 0x6d8   :  { %901 = vst.msk [vmem:[#allocation2 + $0x8] sm:$0xff] %vm675_vm3, %v899_v62  ;;  %v898_v63 = vsel %vm888_vm9, %v879_v52, %v946_v61 }
 0x6d9   :  { %900 = vst.msk [vmem:[#allocation2] sm:$0xff] %vm675_vm3, %v898_v63 }
 0x6da   :  { %1266 = shalt.err (!%p1263_p4)
}
 0x6db   :  { %s1267_s29 = scalar_lea.hbm %s1567_s10, 256 }
 0x6dc   :  { %p1268_p5 = scmp.ne.s32.totalorder %s1567_s10, %s1267_s29  ;;  %p1271_p6 = scmp.lt.u32.totalorder %s1267_s29, %s1567_s10 }
 0x6de   :  { %p1273_p7 = pnand %p1271_p6, %p1268_p5 }
 0x6e0   :  { %1276 = shalt.err (!%p1273_p7)
}
 0x6e1   :  { %s1283_s3 = smov 128   ;;  %s1284_s12 = smov 8  }
 0x6e2   :  { %913 = dma.vmem_to_hbm [thread:$0]  %s908_s9, 256, %s1567_s10, [#allocation3], %s1283_s3, %s1283_s3, %s1284_s12  }
 0x6e3   :  { %1277 = dma.done.wait [#allocation3], 256  }
 0x6e4   :  { %1278 = vsyncadd [#allocation3], 4294967040 }
 0x6e5   :  { %917 = vsyncpa [#allocation3], 1 }

</bundles_post_ra>
